<compile_context>
chip_gen: v7x
topology: tpu7x:2x2x1
jax: 0.10.0
libtpu: 0.0.40
codegen_flags: <defaults>
</compile_context>

<pallas_src>
import functools

import jax
import jax.numpy as jnp
from jax.experimental import pallas as pl
from jax.experimental.pallas import tpu as pltpu


def _round_up(x, m):
    return ((x + m - 1) // m) * m


def _cdiv(a, b):
    return -(-a // b)


def _largest_divisor_tile(padded, tmax):
    """Largest multiple of 128 that divides `padded` (itself a multiple of 128)
    and is <= tmax; `padded` itself if it already fits."""
    if padded <= tmax:
        return padded
    best = 128
    for t in range(256, tmax + 1, 128):
        if padded % t == 0:
            best = t
    return best


def _tile_config():
    """Per-TPU-generation tile caps + scoped-VMEM budget."""
    try:
        kind = jax.devices()[0].device_kind.lower()
    except Exception:
        kind = ""
    if "v5 lite" in kind or "v5e" in kind or "v5lite" in kind:
        # v5e: 4x 128x128 MXU, 128 MiB VMEM, lowest HBM BW -> big K blocks.
        return dict(tm_max=512, tn_max=512, tk_max=1024,
                    vmem=96 * 1024 * 1024, two_tc=False)
    if "v6" in kind or "trillium" in kind:
        # v6e: 256x256 MXU, 128 MiB VMEM.
        return dict(tm_max=512, tn_max=512, tk_max=1024,
                    vmem=96 * 1024 * 1024, two_tc=False)
    # v7x / unknown: 64 MiB physical VMEM, 2 TCs. 512/512/1024 bf16 tiles are
    # ~13 MiB double-buffered -> comfortably inside a 48 MiB scoped budget.
    return dict(tm_max=512, tn_max=512, tk_max=1024,
                vmem=48 * 1024 * 1024, two_tc=True)


def _complex_linear_kernel(xr_ref, xi_ref, w_ref, bd_ref, bs_ref,
                           or_ref, oi_ref, *, stacked):
    """One (i, j, k) grid step.

    xr_ref : (tm, tk)     bf16 x.real tile
    xi_ref : (tm, tk)     bf16 x.imag tile
    w_ref  : (2, tk, tn)  bf16, plane 0 = Wr^T tile, plane 1 = Wi^T tile
    bd_ref : (1, tn)      f32  b_r - b_i
    bs_ref : (1, tn)      f32  b_r + b_i
    or_ref : (tm, tn)     f32 real output tile (doubles as the K accumulator)
    oi_ref : (tm, tn)     f32 imag output tile (doubles as the K accumulator)
    """
    k = pl.program_id(2)

    @pl.when(k == 0)
    def _init():
        # Output blocks are VMEM-resident across the K axis (index_map ignores
        # k), so the bias is the accumulator initializer: no scratch, no
        # finalize copy pass.
        or_ref[...] = jnp.broadcast_to(bd_ref[...], or_ref.shape)
        oi_ref[...] = jnp.broadcast_to(bs_ref[...], oi_ref.shape)

    if stacked:
        # Small batch tile: stack real/imag rows so each weight plane makes one
        # MXU pass at 2x row occupancy (2 dots instead of 4 per step).
        xs = jnp.concatenate([xr_ref[...], xi_ref[...]], axis=0)         # (2*tm, tk)
        y_r = jnp.dot(xs, w_ref[0], preferred_element_type=jnp.float32)  # [xr@WrT ; xi@WrT]
        y_i = jnp.dot(xs, w_ref[1], preferred_element_type=jnp.float32)  # [xr@WiT ; xi@WiT]
        tm = or_ref.shape[0]
        or_ref[...] += y_r[:tm, :] - y_i[tm:, :]                         # xr@WrT - xi@WiT
        oi_ref[...] += y_i[:tm, :] + y_r[tm:, :]                         # xr@WiT + xi@WrT
    else:
        # Large batch tile: MXU rows already full, skip the VMEM concat copy.
        xr = xr_ref[...]
        xi = xi_ref[...]
        wr = w_ref[0]
        wi = w_ref[1]
        or_ref[...] += (jnp.dot(xr, wr, preferred_element_type=jnp.float32)
                        - jnp.dot(xi, wi, preferred_element_type=jnp.float32))
        oi_ref[...] += (jnp.dot(xi, wr, preferred_element_type=jnp.float32)
                        + jnp.dot(xr, wi, preferred_element_type=jnp.float32))


def prepare_complex_linear_params(w_r, w_i, b_r, b_i):
    """One-time (off the hot path) packing of ComplexLinear parameters.

    w_r, w_i : [out_features, in_features]   (PyTorch nn.Linear layout)
    b_r, b_i : [out_features]
    """
    out_f, in_f = w_r.shape
    # Pad to lane multiples FIRST; tiles are later picked as divisors of these
    # extents, so padding never exceeds 127 elements per axis.
    k_pad = _round_up(in_f, 128)
    n_pad = _round_up(out_f, 128)

    def pack_w(w):
        w = jnp.asarray(w, jnp.float32).T                           # [in, out] (once)
        w = jnp.pad(w, ((0, k_pad - in_f), (0, n_pad - out_f)))
        return w.astype(jnp.bfloat16)                               # bf16 storage, f32 accum

    w3 = jnp.stack([pack_w(w_r), pack_w(w_i)], axis=0)              # [2, K_pad, N_pad]

    b_r = jnp.asarray(b_r, jnp.float32)
    b_i = jnp.asarray(b_i, jnp.float32)

    def pack_b(b):
        return jnp.pad(b, (0, n_pad - out_f)).reshape(1, n_pad)

    return dict(
        w3=w3,
        b_diff=pack_b(b_r - b_i),     # real-part bias
        b_sum=pack_b(b_r + b_i),      # imag-part bias
        out_features=out_f,
    )


@functools.partial(jax.jit, static_argnames=("out_features",))
def _complex_linear_apply(x_real, x_imag, w3, b_diff, b_sum, *, out_features):
    cfg = _tile_config()
    b, in_f = x_real.shape
    _, k_pad, n_pad = w3.shape

    # --- M tiling: minimal padding (m_tiles first, then tm) ---
    m_tiles = _cdiv(b, cfg["tm_max"])
    tm = _round_up(_cdiv(b, m_tiles), 8)
    b_pad = m_tiles * tm

    # --- K / N tiles divide the 128-padded extents: zero wasted work ---
    tk = _largest_divisor_tile(k_pad, cfg["tk_max"])
    tn = _largest_divisor_tile(n_pad, cfg["tn_max"])
    # v7x (2 TCs): when the batch fits one M tile, cap the N tile so a
    # "parallel" grid axis has >= 2 tiles and both TensorCores stay busy.
    if cfg["two_tc"] and m_tiles == 1 and n_pad >= 256:
        cap = max(128, (n_pad // 2) // 128 * 128)
        tn = _largest_divisor_tile(n_pad, min(cfg["tn_max"], cap))

    # Small batch tile -> stack real/imag rows inside the kernel; large tile ->
    # per-plane dots (MXU rows already full, skip the concat copy).
    stacked = tm < 256

    def pad_x(x):
        x = x.astype(jnp.bfloat16)
        return jnp.pad(x, ((0, b_pad - b), (0, k_pad - in_f)))

    xr = pad_x(x_real)
    xi = pad_x(x_imag)

    grid = (m_tiles, n_pad // tn, k_pad // tk)
    kernel = functools.partial(_complex_linear_kernel, stacked=stacked)

    out_r, out_i = pl.pallas_call(
        kernel,
        out_shape=(jax.ShapeDtypeStruct((b_pad, n_pad), jnp.float32),
                   jax.ShapeDtypeStruct((b_pad, n_pad), jnp.float32)),
        grid_spec=pltpu.PrefetchScalarGridSpec(
            num_scalar_prefetch=0,
            grid=grid,
            in_specs=[
                pl.BlockSpec((tm, tk), lambda i, j, k: (i, k)),        # x.real
                pl.BlockSpec((tm, tk), lambda i, j, k: (i, k)),        # x.imag
                pl.BlockSpec((2, tk, tn), lambda i, j, k: (0, k, j)),  # [Wr^T | Wi^T]
                pl.BlockSpec((1, tn), lambda i, j, k: (0, j)),         # b_r - b_i
                pl.BlockSpec((1, tn), lambda i, j, k: (0, j)),         # b_r + b_i
            ],
            out_specs=(pl.BlockSpec((tm, tn), lambda i, j, k: (i, j)),
                       pl.BlockSpec((tm, tn), lambda i, j, k: (i, j))),
        ),
        compiler_params=pltpu.CompilerParams(
            dimension_semantics=("parallel", "parallel", "arbitrary"),
            vmem_limit_bytes=cfg["vmem"],
        ),
    )(xr, xi, w3, b_diff, b_sum)

    # TODO(synk): emitting an interleaved [B, N, 2] f32 slab from the kernel and
    # bitcasting to complex64 would save one output pass; kept lax.complex here.
    return jax.lax.complex(out_r[:b, :out_features], out_i[:b, :out_features])


def complex_linear(x_real, x_imag, params):
    """Hot-path forward: x_real/x_imag [B, in_features] -> complex64 [B, out_features]."""
    return _complex_linear_apply(
        x_real, x_imag, params["w3"], params["b_diff"], params["b_sum"],
        out_features=params["out_features"])


if __name__ == "__main__":
    def run_case(key, batch, in_features, out_features):
        k_xr, k_xi, k_wr, k_wi, k_br, k_bi = jax.random.split(key, 6)
        bound = 1.0 / jnp.sqrt(jnp.float32(in_features))
        w_r = jax.random.uniform(k_wr, (out_features, in_features), jnp.float32, -bound, bound)
        w_i = jax.random.uniform(k_wi, (out_features, in_features), jnp.float32, -bound, bound)
        b_r = jax.random.uniform(k_br, (out_features,), jnp.float32, -bound, bound)
        b_i = jax.random.uniform(k_bi, (out_features,), jnp.float32, -bound, bound)
        x_real = jax.random.normal(k_xr, (batch, in_features), jnp.float32)
        x_imag = jax.random.normal(k_xi, (batch, in_features), jnp.float32)

        params = prepare_complex_linear_params(w_r, w_i, b_r, b_i)  # once, off hot path
        out = jax.block_until_ready(complex_linear(x_real, x_imag, params))

        ref_real = x_real @ w_r.T + b_r - (x_imag @ w_i.T + b_i)
        ref_imag = x_imag @ w_r.T + b_r + (x_real @ w_i.T + b_i)
        ref = jax.lax.complex(ref_real, ref_imag)
        assert out.shape == (batch, out_features) and out.dtype == jnp.complex64
        err = float(jnp.max(jnp.abs(out - ref)))
        # Tolerance accounts for bf16 operand storage (f32 MXU accumulation).
        assert jnp.allclose(out, ref, atol=5e-2, rtol=5e-2), err

    key = jax.random.PRNGKey(0)
    k1, k2 = jax.random.split(key)
    # Small shape matching the OFDM ComplexLinear use case (padded internally to lanes).
    run_case(k1, batch=8, in_features=32, out_features=16)
    # Unaligned shape exercising padding-to-128 and divisor-tile selection.
    run_case(k2, batch=24, in_features=640, out_features=200)

    print("KERNEL_OK")
</pallas_src>

<mosaic_0001>
module attributes {stable_mosaic.version = 11 : i64} {
  func.func @_complex_linear_kernel(%arg0: i32, %arg1: i32, %arg2: i32, %arg3: memref<8x128xbf16, #tpu.memory_space<vmem>>, %arg4: memref<8x128xbf16, #tpu.memory_space<vmem>>, %arg5: memref<2x128x128xbf16, #tpu.memory_space<vmem>>, %arg6: memref<1x128xf32, #tpu.memory_space<vmem>>, %arg7: memref<1x128xf32, #tpu.memory_space<vmem>>, %arg8: memref<8x128xf32, #tpu.memory_space<vmem>>, %arg9: memref<8x128xf32, #tpu.memory_space<vmem>>) attributes {dimension_semantics = [#tpu.dimension_semantics<parallel>, #tpu.dimension_semantics<parallel>, #tpu.dimension_semantics<arbitrary>], iteration_bounds = array<i64: 1, 1, 1>, scalar_prefetch = 0 : i64, scratch_operands = 0 : i64, tpu.core_type = #tpu.core_type<tc>, window_params = [{transform_indices = @transform_0, window_bounds = array<i64: 8, 128>}, {transform_indices = @transform_1, window_bounds = array<i64: 8, 128>}, {transform_indices = @transform_2, window_bounds = array<i64: 2, 128, 128>}, {transform_indices = @transform_3, window_bounds = array<i64: 1, 128>}, {transform_indices = @transform_4, window_bounds = array<i64: 1, 128>}, {transform_indices = @transform_5, window_bounds = array<i64: 8, 128>}, {transform_indices = @transform_6, window_bounds = array<i64: 8, 128>}]} {
    %c0_i32 = arith.constant 0 : i32
    %0 = arith.cmpi eq, %arg2, %c0_i32 : i32
    %1 = arith.extui %0 : i1 to i32
    %c0_i32_0 = arith.constant 0 : i32
    %2 = arith.cmpi ne, %1, %c0_i32_0 : i32
    scf.if %2 {
      %c0_18 = arith.constant 0 : index
      %c0_19 = arith.constant 0 : index
      %24 = vector.load %arg6[%c0_18, %c0_19] : memref<1x128xf32, #tpu.memory_space<vmem>>, vector<1x128xf32>
      %25 = vector.shape_cast %24 : vector<1x128xf32> to vector<1x128xf32>
      %26 = vector.broadcast %25 : vector<1x128xf32> to vector<8x128xf32>
      %c0_20 = arith.constant 0 : index
      %c0_21 = arith.constant 0 : index
      %27 = vector.load %arg8[%c0_20, %c0_21] : memref<8x128xf32, #tpu.memory_space<vmem>>, vector<8x128xf32>
      tpu.vector_store %arg8[%c0_20, %c0_21], %26 {strides = array<i32>} : memref<8x128xf32, #tpu.memory_space<vmem>>, vector<8x128xf32>,
      %c0_22 = arith.constant 0 : index
      %c0_23 = arith.constant 0 : index
      %28 = vector.load %arg7[%c0_22, %c0_23] : memref<1x128xf32, #tpu.memory_space<vmem>>, vector<1x128xf32>
      %29 = vector.shape_cast %28 : vector<1x128xf32> to vector<1x128xf32>
      %30 = vector.broadcast %29 : vector<1x128xf32> to vector<8x128xf32>
      %c0_24 = arith.constant 0 : index
      %c0_25 = arith.constant 0 : index
      %31 = vector.load %arg9[%c0_24, %c0_25] : memref<8x128xf32, #tpu.memory_space<vmem>>, vector<8x128xf32>
      tpu.vector_store %arg9[%c0_24, %c0_25], %30 {strides = array<i32>} : memref<8x128xf32, #tpu.memory_space<vmem>>, vector<8x128xf32>,
    } else {
    }
    %c0 = arith.constant 0 : index
    %c0_1 = arith.constant 0 : index
    %3 = vector.load %arg3[%c0, %c0_1] : memref<8x128xbf16, #tpu.memory_space<vmem>>, vector<8x128xbf16>
    %c0_2 = arith.constant 0 : index
    %c0_3 = arith.constant 0 : index
    %4 = vector.load %arg4[%c0_2, %c0_3] : memref<8x128xbf16, #tpu.memory_space<vmem>>, vector<8x128xbf16>
    %5 = tpu.concatenate %3, %4 in 0 : vector<8x128xbf16>, vector<8x128xbf16> -> vector<16x128xbf16>
    %c0_4 = arith.constant 0 : index
    %c0_5 = arith.constant 0 : index
    %c0_6 = arith.constant 0 : index
    %6 = vector.load %arg5[%c0_4, %c0_5, %c0_6] : memref<2x128x128xbf16, #tpu.memory_space<vmem>>, vector<1x128x128xbf16>
    %7 = vector.shape_cast %6 : vector<1x128x128xbf16> to vector<128x128xbf16>
    %cst = arith.constant dense<0.000000e+00> : vector<16x128xf32>
    %8 = tpu.matmul %5, %7, %cst {dimension_numbers = #tpu.dot_dimension_numbers<[1], [0], [0], [1], [0, 0, 1, 1], [], []>} : vector<16x128xbf16>, vector<128x128xbf16>, vector<16x128xf32> -> vector<16x128xf32>
    %c1 = arith.constant 1 : index
    %c0_7 = arith.constant 0 : index
    %c0_8 = arith.constant 0 : index
    %9 = vector.load %arg5[%c1, %c0_7, %c0_8] : memref<2x128x128xbf16, #tpu.memory_space<vmem>>, vector<1x128x128xbf16>
    %10 = vector.shape_cast %9 : vector<1x128x128xbf16> to vector<128x128xbf16>
    %cst_9 = arith.constant dense<0.000000e+00> : vector<16x128xf32>
    %11 = tpu.matmul %5, %10, %cst_9 {dimension_numbers = #tpu.dot_dimension_numbers<[1], [0], [0], [1], [0, 0, 1, 1], [], []>} : vector<16x128xbf16>, vector<128x128xbf16>, vector<16x128xf32> -> vector<16x128xf32>
    %c0_10 = arith.constant 0 : index
    %c0_11 = arith.constant 0 : index
    %12 = vector.load %arg8[%c0_10, %c0_11] : memref<8x128xf32, #tpu.memory_space<vmem>>, vector<8x128xf32>
    %13 = vector.extract_strided_slice %8 {offsets = [0, 0], sizes = [8, 128], strides = [1, 1]} : vector<16x128xf32> to vector<8x128xf32>
    %14 = vector.extract_strided_slice %11 {offsets = [8, 0], sizes = [8, 128], strides = [1, 1]} : vector<16x128xf32> to vector<8x128xf32>
    %15 = arith.subf %13, %14 : vector<8x128xf32>
    %16 = arith.addf %12, %15 : vector<8x128xf32>
    %c0_12 = arith.constant 0 : index
    %c0_13 = arith.constant 0 : index
    %17 = vector.load %arg8[%c0_12, %c0_13] : memref<8x128xf32, #tpu.memory_space<vmem>>, vector<8x128xf32>
    tpu.vector_store %arg8[%c0_12, %c0_13], %16 {strides = array<i32>} : memref<8x128xf32, #tpu.memory_space<vmem>>, vector<8x128xf32>,
    %c0_14 = arith.constant 0 : index
    %c0_15 = arith.constant 0 : index
    %18 = vector.load %arg9[%c0_14, %c0_15] : memref<8x128xf32, #tpu.memory_space<vmem>>, vector<8x128xf32>
    %19 = vector.extract_strided_slice %11 {offsets = [0, 0], sizes = [8, 128], strides = [1, 1]} : vector<16x128xf32> to vector<8x128xf32>
    %20 = vector.extract_strided_slice %8 {offsets = [8, 0], sizes = [8, 128], strides = [1, 1]} : vector<16x128xf32> to vector<8x128xf32>
    %21 = arith.addf %19, %20 : vector<8x128xf32>
    %22 = arith.addf %18, %21 : vector<8x128xf32>
    %c0_16 = arith.constant 0 : index
    %c0_17 = arith.constant 0 : index
    %23 = vector.load %arg9[%c0_16, %c0_17] : memref<8x128xf32, #tpu.memory_space<vmem>>, vector<8x128xf32>
    tpu.vector_store %arg9[%c0_16, %c0_17], %22 {strides = array<i32>} : memref<8x128xf32, #tpu.memory_space<vmem>>, vector<8x128xf32>,
    return
  }
  func.func @transform_0(%arg0: i32, %arg1: i32, %arg2: i32) -> (i32, i32) {
    %c0_i32 = arith.constant 0 : i32
    return %arg0, %arg2 : i32, i32
  }
  func.func @transform_1(%arg0: i32, %arg1: i32, %arg2: i32) -> (i32, i32) {
    %c0_i32 = arith.constant 0 : i32
    return %arg0, %arg2 : i32, i32
  }
  func.func @transform_2(%arg0: i32, %arg1: i32, %arg2: i32) -> (i32, i32, i32) {
    %c0_i32 = arith.constant 0 : i32
    %c0_i32_0 = arith.constant 0 : i32
    return %c0_i32, %arg2, %arg1 : i32, i32, i32
  }
  func.func @transform_3(%arg0: i32, %arg1: i32, %arg2: i32) -> (i32, i32) {
    %c0_i32 = arith.constant 0 : i32
    %c0_i32_0 = arith.constant 0 : i32
    return %c0_i32, %arg1 : i32, i32
  }
  func.func @transform_4(%arg0: i32, %arg1: i32, %arg2: i32) -> (i32, i32) {
    %c0_i32 = arith.constant 0 : i32
    %c0_i32_0 = arith.constant 0 : i32
    return %c0_i32, %arg1 : i32, i32
  }
  func.func @transform_5(%arg0: i32, %arg1: i32, %arg2: i32) -> (i32, i32) {
    %c0_i32 = arith.constant 0 : i32
    return %arg0, %arg1 : i32, i32
  }
  func.func @transform_6(%arg0: i32, %arg1: i32, %arg2: i32) -> (i32, i32) {
    %c0_i32 = arith.constant 0 : i32
    return %arg0, %arg1 : i32, i32
  }
}

</mosaic_0001>

<bundles_post_ra>
// kernel: custom-call
= control target key start
LH: loop header
LB: loop body
LE: loop exit
PB: predicated region body
PF: predicated region fallthrough
CT: control target
= control target key end

     0   :  { %s126_s0 = inlined_call_operand.vmem [shape: f32[8,16], index: 0, kind: input, shape index: {}]   ;;  %s127_s1 = inlined_call_operand.vmem [shape: f32[8,16], index: 1, kind: input, shape index: {}]   ;;  %s128_s2 = inlined_call_operand.hbm [shape: c64[8,16], index: 2, kind: output, shape index: {}]  }
   0x1   :  { %s87_s11 = scalar_lea.hbm %s128_s2, 128 }
   0x2   :  { %4 = vsyncpa [#allocation0], 0  ;;  %s5_s14 = sshll.u32 %s126_s0, 4  ;;  %s6_s14 = int_to_ptr.vmem [resolvable:$true] %s5_s14 }
   0x3   :  { %s18_s15 = scalar_lea.vmem %s6_s14, 128  ;;  %p23_p1 = scmp.lt.s32.totalorder %s6_s14, %s6_s14 }
   0x4   :  { %p19_p0 = scmp.ne.s32.totalorder %s6_s14, %s18_s15  ;;  %p24_p2 = scmp.lt.s32.totalorder %s18_s15, %s18_s15 }
   0x6   :  { %p25_p3 = por %p24_p2, %p23_p1 }
   0x8   :  { %p26_p4 = pnand %p25_p3, %p19_p0 }
   0xa   :  { %29 = shalt.err (!%p26_p4)  }
   0xb   :  { %p31_p5 = scmp.ne.s32.totalorder %s128_s2, %s87_s11  ;;  %s32_s0 = scalar_lea.hbm %s128_s2, 256 }
   0xc   :  { %p33_p6 = scmp.lt.u32.totalorder %s32_s0, %s87_s11  ;;  %p34_p7 = scmp.lt.u32.totalorder %s87_s11, %s128_s2 }
   0xe   :  { %p35_p8 = por %p34_p7, %p33_p6 }
  0x10   :  { %p36_p9 = pnand %p35_p8, %p31_p5 }
  0x12   :  { %39 = shalt.err (!%p36_p9)  }
  0x13   :  { %8 = dma.vmem_to_hbm [thread:$0]  %s6_s14, 128, %s128_s2, [#allocation0] }
  0x14   :  { %65 = dma.done.wait [#allocation0], 128  }
  0x15   :  { %66 = vsyncadd [#allocation0], 4294967168 }
  0x16   :  { %10 = vsyncpa [#allocation0], 1 }
  0x17   :  { %11 = vsyncpa [#allocation1], 0  ;;  %s12_s28 = sshll.u32 %s127_s1, 4  ;;  %s13_s28 = int_to_ptr.vmem [resolvable:$true] %s12_s28 }
  0x18   :  { %s40_s29 = scalar_lea.vmem %s13_s28, 128  ;;  %p45_p11 = scmp.lt.s32.totalorder %s13_s28, %s13_s28 }
  0x19   :  { %p41_p10 = scmp.ne.s32.totalorder %s13_s28, %s40_s29  ;;  %p46_p12 = scmp.lt.s32.totalorder %s40_s29, %s40_s29 }
  0x1b   :  { %p47_p13 = por %p46_p12, %p45_p11 }
  0x1d   :  { %p48_p0 = pnand %p47_p13, %p41_p10 }
  0x1f   :  { %51 = shalt.err (!%p48_p0)  }
  0x20   :  { %p53_p1 = scmp.ne.s32.totalorder %s87_s11, %s32_s0  ;;  %p56_p2 = scmp.lt.u32.totalorder %s32_s0, %s32_s0 }
  0x22   :  { %p57_p3 = por %p56_p2, %p34_p7 }
  0x24   :  { %p59_p4 = por %p57_p3, %p33_p6 }
  0x26   :  { %p60_p5 = pnand %p59_p4, %p53_p1 }
  0x28   :  { %63 = shalt.err (!%p60_p5)  }
  0x29   :  { %15 = dma.vmem_to_hbm [thread:$0]  %s13_s28, 128, %s87_s11, [#allocation1] }
  0x2a   :  { %67 = dma.done.wait [#allocation1], 128  }
  0x2b   :  { %68 = vsyncadd [#allocation1], 4294967168 }
  0x2c   :  { %17 = vsyncpa [#allocation1], 1 }

// kernel: _complex_linear_apply.1
= control target key start
LH: loop header
LB: loop body
LE: loop exit
PB: predicated region body
PF: predicated region fallthrough
CT: control target
= control target key end

     0   :  { %12 = vsyncpa [#allocation3], 0  ;;  %s418_s21 = smov [#allocation2]   ;;  %s488_s0 = inlined_call_operand.vmem [shape: bf16[8,128], index: 0, kind: input, shape index: {}]   ;;  %s489_s1 = inlined_call_operand.vmem [shape: bf16[8,128], index: 1, kind: input, shape index: {}]   ;;  %s490_s2 = inlined_call_operand.hbm [shape: bf16[2,128,128], index: 2, kind: input, shape index: {}]   ;;  %s491_s3 = inlined_call_operand.vmem [shape: f32[1,128], index: 3, kind: input, shape index: {}]   ;;  %s492_s4 = inlined_call_operand.vmem [shape: f32[1,128], index: 4, kind: input, shape index: {}]   ;;  %s493_s5 = inlined_call_operand.vmem [shape: f32[8,128], index: 5, kind: output, shape index: {0}]   ;;  %s494_s6 = inlined_call_operand.vmem [shape: f32[8,128], index: 6, kind: output, shape index: {1}]  }
   0x1   :  { %s22_s22 = sshll.u32 %s418_s21, 4  ;;  %s394_s25 = scalar_lea.hbm %s490_s2, 2048  ;;  %s23_s22 = int_to_ptr.vmem [resolvable:$true] %s22_s22 }
   0x2   :  { %p395_p0 = scmp.ne.s32.totalorder %s490_s2, %s394_s25  ;;  %p398_p1 = scmp.lt.u32.totalorder %s394_s25, %s490_s2 }
   0x4   :  { %p400_p2 = pnand %p398_p1, %p395_p0 }
   0x6   :  { %403 = shalt.err (!%p400_p2)
}
   0x7   :  { %s404_s30 = scalar_lea.vmem %s23_s22, 2048  ;;  %p409_p4 = scmp.lt.s32.totalorder %s23_s22, %s23_s22 }
   0x8   :  { %p405_p3 = scmp.ne.s32.totalorder %s23_s22, %s404_s30  ;;  %p410_p5 = scmp.lt.s32.totalorder %s404_s30, %s404_s30 }
   0xa   :  { %p411_p6 = por %p410_p5, %p409_p4 }
   0xc   :  { %p412_p7 = pnand %p411_p6, %p405_p3 }
   0xe   :  { %415 = shalt.err (!%p412_p7)
}
   0xf   :  { %s419_s7 = smov 64   ;;  %s420_s8 = smov 4  }
  0x10   :  { %28 = dma.hbm_to_vmem [thread:$0]  %s490_s2, 2048, %s23_s22, [#allocation3], %s419_s7, %s419_s7, %s420_s8  }
  0x11   :  { %416 = dma.done.wait [#allocation3], 2048  }
  0x12   :  { %417 = vsyncadd [#allocation3], 4294965248  ;;  %v421_v0 = vmov 0.0   ;;  %vm422_vm0 = vmmov 0   ;;  %v377_v1 = vld [vmem:[#allocation2] sm:$0xff]   ;;  %v379_v3 = vld [vmem:[#allocation2 + $0x8] sm:$0xff]  }
  0x13   :  { %332 = vmatprep.subr.bf16.mxu0 %v421_v0  ;;  %352 = vmatprep.subr.bf16.mxu1 %v421_v0  ;;  %v378_v2 = vld [vmem:[#allocation2 + $0x40] sm:$0xff]   ;;  %v380_v4 = vld [vmem:[#allocation2 + $0x48] sm:$0xff]   ;;  %v381_v5 = vld [vmem:[#allocation2 + $0x10] sm:$0xff]   ;;  %vm62_vm1 = vcmask 1043456  }
  0x14   :  { %348 = vmatprep.mubr.msk.bf16.mxu0 %vm422_vm0, %v421_v0  ;;  %368 = vmatprep.mubr.msk.bf16.mxu1 %vm422_vm0, %v421_v0  ;;  %v382_v6 = vld [vmem:[#allocation2 + $0x50] sm:$0xff]   ;;  %v383_v7 = vld [vmem:[#allocation2 + $0x18] sm:$0xff]   ;;  %v385_v9 = vld [vmem:[#allocation2 + $0x20] sm:$0xff]  }
  0x15   :  { %333 = vmatpush3.bf16.msra.mxu0 %v377_v1  ;;  %353 = vmatpush3.bf16.msra.mxu1 %v378_v2  ;;  %v384_v8 = vld [vmem:[#allocation2 + $0x58] sm:$0xff]   ;;  %v386_v10 = vld [vmem:[#allocation2 + $0x60] sm:$0xff]   ;;  %v387_v11 = vld [vmem:[#allocation2 + $0x28] sm:$0xff]  }
  0x16   :  { %334 = vmatprep.subr.bf16.mxu0 %v421_v0  ;;  %354 = vmatprep.subr.bf16.mxu1 %v421_v0  ;;  %v388_v12 = vld [vmem:[#allocation2 + $0x68] sm:$0xff]   ;;  %v389_v13 = vld [vmem:[#allocation2 + $0x30] sm:$0xff]   ;;  %v391_v15 = vld [vmem:[#allocation2 + $0x38] sm:$0xff]  }
  0x17   :  { %v390_v14 = vld [vmem:[#allocation2 + $0x70] sm:$0xff]   ;;  %v393_v16 = vld [vmem:[%s489_s1] ss:$0 sps:$4 sm:$0xff]   ;;  %v392_v17 = vld [vmem:[#allocation2 + $0x78] sm:$0xff]  }
  0x18   :  { %v57_v18 = vld [vmem:[%s488_s0] sm:$0xf] }
  0x19   :  { %335 = vmatpush3.bf16.msra.mxu0 %v379_v3  ;;  %355 = vmatpush3.bf16.msra.mxu1 %v380_v4  ;;  %v65_v19 = vsel %vm62_vm1, %v57_v18, %v393_v16  ;;  %v296_v24 = vld [vmem:[%s492_s4] ss:$0 sm:$0xff] }
  0x1a   :  { %336 = vmatprep.subr.bf16.mxu0 %v421_v0  ;;  %356 = vmatprep.subr.bf16.mxu1 %v421_v0  ;;  %v295_v27 = vld [vmem:[%s491_s3] ss:$0 sm:$0xff] }
  0x1d   :  { %337 = vmatpush3.bf16.msra.mxu0 %v381_v5  ;;  %357 = vmatpush3.bf16.msra.mxu1 %v382_v6 }
  0x1e   :  { %338 = vmatprep.subr.bf16.mxu0 %v421_v0  ;;  %358 = vmatprep.subr.bf16.mxu1 %v421_v0 }
  0x21   :  { %339 = vmatpush3.bf16.msra.mxu0 %v383_v7  ;;  %359 = vmatpush3.bf16.msra.mxu1 %v384_v8 }
  0x22   :  { %340 = vmatprep.subr.bf16.mxu0 %v421_v0  ;;  %360 = vmatprep.subr.bf16.mxu1 %v421_v0 }
  0x25   :  { %341 = vmatpush3.bf16.msra.mxu0 %v385_v9  ;;  %361 = vmatpush3.bf16.msra.mxu1 %v386_v10 }
  0x26   :  { %342 = vmatprep.subr.bf16.mxu0 %v421_v0  ;;  %362 = vmatprep.subr.bf16.mxu1 %v421_v0 }
  0x29   :  { %343 = vmatpush3.bf16.msra.mxu0 %v387_v11  ;;  %363 = vmatpush3.bf16.msra.mxu1 %v388_v12 }
  0x2a   :  { %344 = vmatprep.subr.bf16.mxu0 %v421_v0  ;;  %364 = vmatprep.subr.bf16.mxu1 %v421_v0 }
  0x2d   :  { %345 = vmatpush3.bf16.msra.mxu0 %v389_v13  ;;  %365 = vmatpush3.bf16.msra.mxu1 %v390_v14 }
  0x2e   :  { %346 = vmatprep.subr.bf16.mxu0 %v421_v0  ;;  %366 = vmatprep.subr.bf16.mxu1 %v421_v0 }
  0x31   :  { %347 = vmatpush3.bf16.msra.mxu0 %v391_v15  ;;  %367 = vmatpush3.bf16.msra.mxu1 %v392_v17 }
  0x34   :  { %349 = vmatmul.mubr.bf16.vlgmr.msra.gmra.mrb[0].mxu0 %v65_v19  ;;  %369 = vmatmul.mubr.bf16.vlgmr.msra.gmra.mrb[0].mxu1 %v65_v19 }
 0x107   :  { %v165_v20 = vpop.f32.mrb[0].mxu0  ;;  %v271_v21 = vpop.f32.mrb[0].mxu1 }
 0x108   :  { %v350_v22 = vpop.f32.mrb[1].mxu0  ;;  %v370_v23 = vpop.f32.mrb[1].mxu1 }
 0x109   :  { %v168_v25 = vpop.f32.mrb[2].mxu0  ;;  %v274_v28 = vpop.f32.mrb[2].mxu1 }
 0x10a   :  { %v283_v26 = vadd.f32 %v271_v21, %v168_v25  ;;  %v351_v29 = vpop.f32.mrb[3].mxu0  ;;  %v279_v30 = vsub.f32 %v165_v20, %v274_v28  ;;  %v371_v31 = vpop.f32.mrb[3].mxu1 }
 0x10c   :  { %v284_v32 = vadd.f32 %v296_v24, %v283_v26  ;;  %v280_v33 = vadd.f32 %v295_v27, %v279_v30 }
 0x10e   :  { %285 = vst [vmem:[%s494_s6] sm:$0xff] %v284_v32  ;;  %281 = vst [vmem:[%s493_s5] sm:$0xff] %v280_v33 }
 0x10f   :  { %294 = vsyncpa [#allocation3], 1 }

</bundles_post_ra>
